<compile_context>
chip_gen: v5e
topology: v5e:2x2
jax: 0.10.0
libtpu: 0.0.40
codegen_flags: <defaults>
</compile_context>

<pallas_src>
import functools

import jax
import jax.numpy as jnp
from jax.experimental import pallas as pl
from jax.experimental.pallas import tpu as pltpu


def _round_up(x, m):
    return ((x + m - 1) // m) * m


def _device_vmem_bytes(default=64 << 20):
    try:
        cap = int(pltpu.get_tpu_info().vmem_capacity_bytes)
        return cap if cap > 0 else default
    except Exception:
        return default


def _rmsnorm_kernel(x_ref, w_ref, o_ref, *, eps, inv_h, input_dtype):
    # x_ref: (tile, H) input dtype; w_ref: (1, H) weight dtype; o_ref: (tile, H) f32
    x = x_ref[...].astype(jnp.float32)
    var = jnp.sum(x * x, axis=-1, keepdims=True) * inv_h   # XLU reduce + const mul
    inv = jax.lax.rsqrt(var + eps)                          # EUP rsqrt
    normed = (x * inv).astype(input_dtype)                  # cast back (matches PyTorch)
    o_ref[...] = (w_ref[...] * normed).astype(o_ref.dtype)  # f32 weight * input-dtype -> f32


def fp16_llama_rmsnorm(hidden_states, weight, eps=1e-6, *,
                       row_tile=1024, vmem_budget_bytes=None):
    """hidden_states: (..., H) any float dtype; weight: (H,) (f32 in the PyTorch module)."""
    orig_shape = hidden_states.shape
    H = orig_shape[-1]
    x2d = hidden_states.reshape(-1, H)
    rows = x2d.shape[0]

    out_dtype = jnp.promote_types(weight.dtype, hidden_states.dtype)
    in_itemsize = jnp.dtype(hidden_states.dtype).itemsize
    out_itemsize = jnp.dtype(out_dtype).itemsize
    w_itemsize = jnp.dtype(weight.dtype).itemsize

    device_vmem = _device_vmem_bytes()
    if vmem_budget_bytes is None:
        vmem_budget_bytes = int(0.4 * device_vmem)   # ~51 MiB v5e/v6e, ~25 MiB v7x

    # --- tile selection -------------------------------------------------------
    # VMEM working set per tile row: double-buffered input + double-buffered output
    # + ~2 tile-sized f32 temporaries from the in-kernel cast / multiply.
    bytes_per_row = H * (2 * in_itemsize + 2 * out_itemsize + 2 * 4)
    max_tile = max(16, vmem_budget_bytes // max(bytes_per_row, 1))
    tile = min(row_tile, max_tile)
    # Keep >= ~4 grid blocks so both v7x TensorCores get work and DMA overlaps compute.
    tile = min(tile, _round_up(pl.cdiv(rows, 4), 16))
    tile = max(16, (tile // 16) * 16)                # multiple of 16 (bf16 sublane packing)
    if tile > rows:
        tile = rows                                  # tiny input: block == full array dims

    # No padding: the partial edge block is read as don't-care and store-masked by Pallas.
    grid = pl.cdiv(rows, tile)

    w2d = weight.reshape(1, H)

    # --- VMEM limit sized to the real footprint, clamped to physical capacity --
    footprint = tile * bytes_per_row + 2 * H * w_itemsize
    vmem_ceiling = min(device_vmem, 128 << 20)
    vmem_limit = int(min(vmem_ceiling, max(32 << 20, footprint + (2 << 20))))

    kernel = functools.partial(
        _rmsnorm_kernel, eps=eps, inv_h=1.0 / H, input_dtype=hidden_states.dtype
    )

    out = pl.pallas_call(
        kernel,
        out_shape=jax.ShapeDtypeStruct((rows, H), out_dtype),
        grid_spec=pltpu.PrefetchScalarGridSpec(
            num_scalar_prefetch=0,
            grid=(grid,),
            in_specs=[
                pl.BlockSpec((tile, H), lambda i: (i, 0)),
                pl.BlockSpec((1, H), lambda i: (0, 0)),   # weight resident, never re-indexed
            ],
            out_specs=pl.BlockSpec((tile, H), lambda i: (i, 0)),
        ),
        compiler_params=pltpu.CompilerParams(
            dimension_semantics=("parallel",),
            vmem_limit_bytes=vmem_limit,
        ),
    )(x2d, w2d)

    return out.reshape(orig_shape[:-1] + (H,))


def _reference(hidden_states, weight, eps=1e-6):
    x = hidden_states.astype(jnp.float32)
    var = jnp.mean(x * x, axis=-1, keepdims=True)
    normed = (x * jax.lax.rsqrt(var + eps)).astype(hidden_states.dtype)
    return weight * normed


if __name__ == "__main__":
    key = jax.random.PRNGKey(0)
    batch, seq, hidden = 2, 8, 32

    # nn.Parameter(torch.ones(hidden_size)) -> ones, float32.
    weight = jnp.ones((hidden,), dtype=jnp.float32)

    # "FP16" module: activations arrive in a low-precision float dtype (bf16 on TPU).
    x = jax.random.normal(key, (batch, seq, hidden), dtype=jnp.float32).astype(jnp.bfloat16)

    out = jax.block_until_ready(fp16_llama_rmsnorm(x, weight, eps=1e-6))
    ref = _reference(x, weight, eps=1e-6)
    assert out.shape == x.shape
    assert out.dtype == ref.dtype
    assert jnp.allclose(out, ref, atol=1e-2, rtol=1e-2), "mismatch vs reference"

    # Non-multiple-of-16 row count -> single full-array block path.
    x2 = jax.random.normal(jax.random.PRNGKey(1), (3, 5, hidden), jnp.float32).astype(jnp.bfloat16)
    out2 = jax.block_until_ready(fp16_llama_rmsnorm(x2, weight, eps=1e-6))
    assert jnp.allclose(out2, _reference(x2, weight, 1e-6), atol=1e-2, rtol=1e-2)

    # Row count that exercises a multi-block grid with a masked partial edge block.
    x3 = jax.random.normal(jax.random.PRNGKey(2), (2, 37, hidden), jnp.float32).astype(jnp.bfloat16)
    out3 = jax.block_until_ready(fp16_llama_rmsnorm(x3, weight, eps=1e-6))
    assert jnp.allclose(out3, _reference(x3, weight, 1e-6), atol=1e-2, rtol=1e-2)

    print("KERNEL_OK")
</pallas_src>

<mosaic_0001>
module attributes {stable_mosaic.version = 11 : i64} {
  func.func @_rmsnorm_kernel(%arg0: i32, %arg1: memref<16x32xbf16, #tpu.memory_space<vmem>>, %arg2: memref<1x32xf32, #tpu.memory_space<vmem>>, %arg3: memref<16x32xf32, #tpu.memory_space<vmem>>) attributes {dimension_semantics = [#tpu.dimension_semantics<parallel>], iteration_bounds = array<i64: 1>, scalar_prefetch = 0 : i64, scratch_operands = 0 : i64, tpu.core_type = #tpu.core_type<tc>, window_params = [{transform_indices = @transform_0, window_bounds = array<i64: 16, 32>}, {pipeline_mode = #tpu.pipeline_mode<synchronous>, transform_indices = @transform_1, window_bounds = array<i64: 1, 32>}, {transform_indices = @transform_2, window_bounds = array<i64: 16, 32>}]} {
    %c0 = arith.constant 0 : index
    %c0_0 = arith.constant 0 : index
    %0 = vector.load %arg1[%c0, %c0_0] : memref<16x32xbf16, #tpu.memory_space<vmem>>, vector<16x32xbf16>
    %1 = arith.extf %0 : vector<16x32xbf16> to vector<16x32xf32>
    %2 = arith.mulf %1, %1 : vector<16x32xf32>
    %cst = arith.constant dense<0.000000e+00> : vector<16xf32>
    %3 = vector.multi_reduction <add>, %2, %cst [1] : vector<16x32xf32> to vector<16xf32>
    %4 = vector.shape_cast %3 : vector<16xf32> to vector<16x1xf32>
    %cst_1 = arith.constant 3.125000e-02 : f32
    %5 = vector.broadcast %cst_1 : f32 to vector<16x1xf32>
    %6 = arith.mulf %4, %5 : vector<16x1xf32>
    %cst_2 = arith.constant 9.99999997E-7 : f32
    %7 = vector.broadcast %cst_2 : f32 to vector<16x1xf32>
    %8 = arith.addf %6, %7 : vector<16x1xf32>
    %9 = math.rsqrt %8 : vector<16x1xf32>
    %10 = vector.broadcast %9 : vector<16x1xf32> to vector<16x32xf32>
    %11 = arith.mulf %1, %10 : vector<16x32xf32>
    %12 = arith.truncf %11 : vector<16x32xf32> to vector<16x32xbf16>
    %c0_3 = arith.constant 0 : index
    %c0_4 = arith.constant 0 : index
    %13 = vector.load %arg2[%c0_3, %c0_4] : memref<1x32xf32, #tpu.memory_space<vmem>>, vector<1x32xf32>
    %14 = arith.extf %12 : vector<16x32xbf16> to vector<16x32xf32>
    %15 = vector.broadcast %13 : vector<1x32xf32> to vector<16x32xf32>
    %16 = arith.mulf %15, %14 : vector<16x32xf32>
    %c0_5 = arith.constant 0 : index
    %c0_6 = arith.constant 0 : index
    %17 = vector.load %arg3[%c0_5, %c0_6] : memref<16x32xf32, #tpu.memory_space<vmem>>, vector<16x32xf32>
    tpu.vector_store %arg3[%c0_5, %c0_6], %16 {strides = array<i32>} : memref<16x32xf32, #tpu.memory_space<vmem>>, vector<16x32xf32>,
    return
  }
  func.func @transform_0(%arg0: i32) -> (i32, i32) {
    %c0_i32 = arith.constant 0 : i32
    %c0_i32_0 = arith.constant 0 : i32
    return %arg0, %c0_i32 : i32, i32
  }
  func.func @transform_1(%arg0: i32) -> (i32, i32) {
    %c0_i32 = arith.constant 0 : i32
    %c0_i32_0 = arith.constant 0 : i32
    %c0_i32_1 = arith.constant 0 : i32
    return %c0_i32, %c0_i32_0 : i32, i32
  }
  func.func @transform_2(%arg0: i32) -> (i32, i32) {
    %c0_i32 = arith.constant 0 : i32
    %c0_i32_0 = arith.constant 0 : i32
    return %arg0, %c0_i32 : i32, i32
  }
}

</mosaic_0001>

<bundles_post_ra>
// kernel: tpu_custom_call.1
= control target key start
LH: loop header
LB: loop body
LE: loop exit
PB: predicated region body
PF: predicated region fallthrough
CT: control target
= control target key end

     0   :  { %7 = vsyncpa [#allocation3], 0  ;;  %s242_s0 = inlined_call_operand.hbm [shape: bf16[16,32], index: 0, kind: input, shape index: {}]   ;;  %s243_s1 = inlined_call_operand.hbm [shape: f32[1,32], index: 1, kind: input, shape index: {}]   ;;  %s244_s2 = inlined_call_operand.hbm [shape: f32[16,32], index: 2, kind: output, shape index: {}]  }
   0x1   :  { %8 = vsyncpa [#allocation6], 0 }
   0x2   :  { %9 = vsyncpa [#allocation4], 0  ;;  %s14_s11 = sshll.u32 %s242_s0, 4  ;;  %s207_s12 = smov [#allocation2]   ;;  %s15_s11 = int_to_ptr.hbm [resolvable:$true] %s14_s11 }
   0x3   :  { %s16_s13 = sshll.u32 %s207_s12, 4  ;;  %s28_s16 = sshll.u32 %s243_s1, 4  ;;  %s17_s13 = int_to_ptr.vmem [resolvable:$true] %s16_s13  ;;  %s29_s16 = int_to_ptr.hbm [resolvable:$true] %s28_s16 }
   0x4   :  { %s208_s17 = smov 64   ;;  %s209_s18 = smov 4  }
   0x5   :  { %22 = dma.hbm_to_vmem [thread:$0]  %s15_s11, 128, %s17_s13, [#allocation3], %s208_s17, %s208_s17, %s209_s18  }
   0x6   :  { %s210_s19 = smov [#allocation5]  }
   0x7   :  { %s30_s20 = sshll.u32 %s210_s19, 4  ;;  %s31_s20 = int_to_ptr.vmem [resolvable:$true] %s30_s20 }
   0x8   :  { %33 = dma.hbm_to_vmem [thread:$0]  %s29_s16, 16, %s31_s20, [#allocation6]  }
   0x9   :  { %201 = dma.done.wait [#allocation3], 128  }
   0xa   :  { %202 = vsyncadd [#allocation3], 4294967168 }
   0xb   :  { %203 = dma.done.wait [#allocation6], 16  }
   0xc   :  { %204 = vsyncadd [#allocation6], 4294967280  ;;  %v114_v0 = vld [vmem:[#allocation2] sm:$0xff]   ;;  %vm48_vm0 = vcmask 261120   ;;  %v124_v25 = vld [vmem:[#allocation5] ss:$0 sm:$0xff] }
   0xd   :  { %v115_v1 = vunpack.c.l.bf16 %v114_v0  ;;  %v116_v3 = vunpack.c.h.bf16 %v114_v0  ;;  %s211_s0 = smov [#allocation7]   ;;  %s99_s23 = sshll.u32 %s244_s2, 4  ;;  %s100_s23 = int_to_ptr.hbm [resolvable:$true] %s99_s23 }
   0xe   :  { %s97_s1 = sshll.u32 %s211_s0, 4  ;;  %s212_s24 = smov 128   ;;  %s98_s1 = int_to_ptr.vmem [resolvable:$true] %s97_s1 }
   0xf   :  { %v46_v2 = vmul.f32 %v115_v1, %v115_v1  ;;  %v47_v5 = vmul.f32 %v116_v3, %v116_v3  ;;  %s213_s25 = smov 8  }
  0x11   :  { %v49_v4 = vsel %vm48_vm0, %v46_v2, 0.0  ;;  %v52_v6 = vsel %vm48_vm0, %v47_v5, 0.0 }
  0x12   :  { %50 = vadd.xlane.f32.xlu0 %v49_v4 }
  0x1a   :  { %53 = vadd.xlane.f32.xlu0 %v52_v6 }
  0x85   :  { %v51_v7 = vpop.xlane.xlu0 %50 }
  0x86   :  { %v55_v8 = vmul.f32 0.03125, %v51_v7 }
  0x88   :  { %v57_v9 = vadd.f32 1e-06, %v55_v8 }
  0x8a   :  { %125 = vrsqrt.f32 %v57_v9  ;;  %vm65_vm2 = vweird.f32 %v57_v9 }
  0x8d   :  { %v54_v10 = vpop.xlane.xlu0 %53 }
  0x8e   :  { %v56_v11 = vmul.f32 0.03125, %v54_v10 }
  0x90   :  { %v126_v12 = vpop.eup %125  ;;  %v58_v13 = vadd.f32 1e-06, %v56_v11 }
  0x91   :  { %v60_v14 = vmul.f32 %v126_v12, %v57_v9  ;;  %vm66_vm1 = vweird.f32 %v126_v12 }
  0x92   :  { %127 = vrsqrt.f32 %v58_v13  ;;  %vm67_vm3 = vmor %vm65_vm2, %vm66_vm1  ;;  %vm75_vm5 = vweird.f32 %v58_v13 }
  0x93   :  { %v61_v15 = vmul.f32 %v126_v12, %v60_v14 }
  0x95   :  { %v62_v16 = vmul.f32 0.5, %v61_v15 }
  0x97   :  { %v63_v17 = vsub.f32 1.5, %v62_v16 }
  0x98   :  { %v128_v18 = vpop.eup %127 }
  0x99   :  { %v64_v19 = vmul.f32 %v126_v12, %v63_v17  ;;  %v70_v20 = vmul.f32 %v128_v18, %v58_v13  ;;  %vm76_vm4 = vweird.f32 %v128_v18 }
  0x9a   :  { %vm77_vm6 = vmor %vm75_vm5, %vm76_vm4 }
  0x9b   :  { %v68_v21 = vsel %vm67_vm3, %v126_v12, %v64_v19  ;;  %v71_v22 = vmul.f32 %v128_v18, %v70_v20 }
  0x9c   :  { %v79_v23 = vmul.f32 %v115_v1, %v68_v21 }
  0x9d   :  { %v72_v24 = vmul.f32 0.5, %v71_v22 }
  0x9e   :  { %v81_v26 = vpack.c.bf16 %v79_v23, %v79_v23 }
  0x9f   :  { %v73_v27 = vsub.f32 1.5, %v72_v24 }
  0xa0   :  { %v84_v28 = vunpack.c.l.bf16 %v81_v26 }
  0xa1   :  { %v74_v29 = vmul.f32 %v128_v18, %v73_v27 }
  0xa2   :  { %v89_v30 = vmul.f32 %v124_v25, %v84_v28 }
  0xa3   :  { %v78_v31 = vsel %vm77_vm6, %v128_v18, %v74_v29 }
  0xa4   :  { %91 = vst.msk [vmem:[#allocation7] sm:$0xff] %vm48_vm0, %v89_v30  ;;  %v80_v32 = vmul.f32 %v116_v3, %v78_v31 }
  0xa6   :  { %v82_v33 = vpack.c.bf16 %v80_v32, %v80_v32 }
  0xa8   :  { %v85_v34 = vunpack.c.l.bf16 %v82_v33 }
  0xaa   :  { %v90_v35 = vmul.f32 %v124_v25, %v85_v34 }
  0xac   :  { %92 = vst.msk [vmem:[#allocation7 + $0x8] sm:$0xff] %vm48_vm0, %v90_v35 }
  0xad   :  { %105 = dma.vmem_to_hbm [thread:$0]  %s98_s1, 256, %s100_s23, [#allocation4], %s212_s24, %s212_s24, %s213_s25  }
  0xae   :  { %205 = dma.done.wait [#allocation4], 256  }
  0xaf   :  { %206 = vsyncadd [#allocation4], 4294967040 }
  0xb0   :  { %110 = vsyncpa [#allocation3], 1 }
  0xb1   :  { %111 = vsyncpa [#allocation6], 1 }
  0xb2   :  { %112 = vsyncpa [#allocation4], 1 }

</bundles_post_ra>
